<compile_context>
chip_gen: v6e
topology: v6e:2x2x1
jax: 0.10.0
libtpu: 0.0.40
codegen_flags: <defaults>
</compile_context>

<pallas_src>
import functools

import jax
import jax.numpy as jnp
from jax.experimental import pallas as pl
from jax.experimental.pallas import tpu as pltpu


def _gat_kernel(edge_ref, x_ref, w_ref, asrc_ref, adst_ref, rep_ref,   # inputs
                out_ref,                                               # output
                h_bf_ref, sd_bf_ref, acc_ref, m_ref, l_ref,            # scratch
                *, num_edges, negative_slope):
    """Fused multi-head GAT, one edge tile per grid step.

    edge_ref: [2, TE] int32   (row 0 = src, row 1 = dst)
    x_ref:    [N, in_dim] f32
    w_ref:    [HD, in_dim] f32   (heads concatenated along rows, HD = H*D)
    asrc_ref: [H, HD] f32        (block-diagonal: a_src of head h in cols h*D:(h+1)*D)
    adst_ref: [H, HD] f32        (block-diagonal with a_dst)
    rep_ref:  [HD, H] f32        (replication matrix: row h*D+d has 1 in column h)
    out_ref:  [HD, N] f32        (transposed output, written at the last tile)
    scratch:  h_bf [HD, N] bf16, sd_bf [H, N] bf16, acc [HD, N] f32, m/l [H, 1] f32
    """
    t = pl.program_id(0)
    n_tiles = pl.num_programs(0)
    NEG = jnp.float32(-1e30)

    N = x_ref.shape[0]
    TE = edge_ref.shape[1]

    # ---- one-time setup (grid is a sequential loop on one TC) ----
    @pl.when(t == 0)
    def _init():
        # Fused projection for all heads, transposed: hT[j, n] = sum_i W[j, i] * x[n, i]
        hT = jax.lax.dot_general(
            w_ref[...], x_ref[...],
            dimension_numbers=(((1,), (1,)), ((), ())),
            preferred_element_type=jnp.float32)                         # [HD, N]
        h_bf_ref[...] = hT.astype(jnp.bfloat16)
        # Per-node destination scores (one per head): s_dst[h, n] = a_dst[h] . h_head[n]
        sd_bf_ref[...] = jnp.dot(
            adst_ref[...], hT,
            preferred_element_type=jnp.float32).astype(jnp.bfloat16)    # [H, N]
        acc_ref[...] = jnp.zeros_like(acc_ref)
        m_ref[...] = jnp.full(m_ref.shape, NEG, dtype=jnp.float32)
        l_ref[...] = jnp.zeros(l_ref.shape, dtype=jnp.float32)

    # ---- per edge-tile work ----
    edges = edge_ref[...]                                   # [2, TE] int32
    src = edges[0:1, :]                                     # [1, TE]
    dst = edges[1:2, :]                                     # [1, TE]

    # One-hot selectors in [N, TE] layout (node ids on sublanes, edges on lanes).
    node_ids = jax.lax.broadcasted_iota(jnp.int32, (N, TE), 0)
    sel_src = (node_ids == src).astype(jnp.float32).astype(jnp.bfloat16)   # [N, TE]
    sel_dst = (node_ids == dst).astype(jnp.float32).astype(jnp.bfloat16)   # [N, TE]

    # Validity mask for the edge-count padding (lane-dense).
    eidx = jax.lax.broadcasted_iota(jnp.int32, (1, TE), 1) + t * TE
    valid = eidx < num_edges                                # [1, TE] bool

    # Gather projected source features for all heads (bf16 MXU, f32 accumulate).
    h_srcT = jnp.dot(h_bf_ref[...], sel_src,
                     preferred_element_type=jnp.float32)    # [HD, TE]

    # Attention logits per (head, edge) — lane-dense [H, TE].
    e_src = jnp.dot(asrc_ref[...], h_srcT,
                    preferred_element_type=jnp.float32)     # [H, TE]
    e_dst = jnp.dot(sd_bf_ref[...], sel_dst,
                    preferred_element_type=jnp.float32)     # [H, TE]
    e = e_src + e_dst
    e = jnp.where(e > 0, e, negative_slope * e)             # leaky_relu
    e = jnp.where(valid, e, NEG)                            # mask padded edges

    # Online global softmax (torch.softmax over ALL edges), per head.
    m_old = m_ref[...]                                      # [H, 1]
    m_new = jnp.maximum(m_old, jnp.max(e, axis=1, keepdims=True))
    scale = jnp.exp(m_old - m_new)                          # [H, 1]
    p = jnp.exp(e - m_new) * valid.astype(jnp.float32)      # [H, TE]
    l_ref[...] = l_ref[...] * scale + jnp.sum(p, axis=1, keepdims=True)
    m_ref[...] = m_new

    # Replicate per-head weights onto the fused feature axis (tiny matmuls).
    p_rep = jnp.dot(rep_ref[...], p,
                    preferred_element_type=jnp.float32)     # [HD, TE]
    scale_rep = jnp.dot(rep_ref[...], scale,
                        preferred_element_type=jnp.float32) # [HD, 1]
    weighted = (p_rep * h_srcT).astype(jnp.bfloat16)        # [HD, TE]

    # Scatter-add over destinations: contrib[j, n] = sum_e weighted[j, e] * sel_dst[n, e]
    contrib = jax.lax.dot_general(
        weighted, sel_dst,
        dimension_numbers=(((1,), (1,)), ((), ())),
        preferred_element_type=jnp.float32)                 # [HD, N]
    acc_ref[...] = acc_ref[...] * scale_rep + contrib

    # ---- finalize: divide by the global softmax denominator, store once ----
    @pl.when(t == n_tiles - 1)
    def _finalize():
        inv_l = pl.reciprocal(l_ref[...], approx=True)      # [H, 1]
        inv_rep = jnp.dot(rep_ref[...], inv_l,
                          preferred_element_type=jnp.float32)  # [HD, 1]
        out_ref[...] = acc_ref[...] * inv_rep


def multi_head_gat_forward(x, edge_index, Wt, a, *, concat=True,
                           negative_slope=0.01, edge_tile=128):
    """
    x:          [N, in_dim] float32
    edge_index: [2, E] int32
    Wt:         [num_heads, in_dim, out_dim] float32  (nn.Linear weights, pre-transposed)
    a:          [num_heads, 2*out_dim, 1] float32     (attn_fc weights, pre-transposed)
    returns:    [N, num_heads*out_dim] if concat else [N, out_dim]
    """
    N, in_dim = x.shape
    H, _, D = Wt.shape
    HD = H * D
    E = edge_index.shape[1]

    # Fused / transposed parameters (host-side, tiny).
    Wcat = jnp.transpose(Wt, (0, 2, 1)).reshape(HD, in_dim)             # [HD, in_dim]
    a_s = a[:, :D, 0]                                                   # [H, D]
    a_d = a[:, D:, 0]                                                   # [H, D]
    eyeH = jnp.eye(H, dtype=jnp.float32)
    A_srcT = (eyeH[:, :, None] * a_s[:, None, :]).reshape(H, HD)        # [H, HD]
    A_dstT = (eyeH[:, :, None] * a_d[:, None, :]).reshape(H, HD)        # [H, HD]
    REPT = jnp.repeat(eyeH, D, axis=0)                                  # [HD, H]

    # Pad edges (lane-dense [2, E]) up to a multiple of the 128-aligned edge tile.
    TE = edge_tile
    E_pad = ((E + TE - 1) // TE) * TE
    edges = jnp.zeros((2, E_pad), jnp.int32).at[:, :E].set(
        jnp.asarray(edge_index, jnp.int32))

    kernel = functools.partial(_gat_kernel, num_edges=E,
                               negative_slope=negative_slope)

    outT = pl.pallas_call(
        kernel,
        out_shape=jax.ShapeDtypeStruct((HD, N), jnp.float32),
        grid=(E_pad // TE,),
        in_specs=[
            pl.BlockSpec((2, TE), lambda t: (0, t)),          # edge tile
            pl.BlockSpec((N, in_dim), lambda t: (0, 0)),      # x (resident)
            pl.BlockSpec((HD, in_dim), lambda t: (0, 0)),     # fused W
            pl.BlockSpec((H, HD), lambda t: (0, 0)),          # A_srcT
            pl.BlockSpec((H, HD), lambda t: (0, 0)),          # A_dstT
            pl.BlockSpec((HD, H), lambda t: (0, 0)),          # head replication
        ],
        out_specs=pl.BlockSpec((HD, N), lambda t: (0, 0)),    # resident accumulator out
        scratch_shapes=[
            pltpu.VMEM((HD, N), jnp.bfloat16),                # hT (bf16 for gathers)
            pltpu.VMEM((H, N), jnp.bfloat16),                 # s_dst per node
            pltpu.VMEM((HD, N), jnp.float32),                 # scatter accumulator
            pltpu.VMEM((H, 1), jnp.float32),                  # running max
            pltpu.VMEM((H, 1), jnp.float32),                  # running sum
        ],
        compiler_params=pltpu.CompilerParams(
            dimension_semantics=("arbitrary",),               # edge-tile reduction axis
            vmem_limit_bytes=32 * 1024 * 1024),
    )(edges, x, Wcat, A_srcT, A_dstT, REPT)

    out = outT.T                                              # [N, HD], heads concatenated
    if concat:
        return out
    return out.reshape(N, H, D).mean(axis=1)


def _reference_forward(x, edge_index, Wt, a, *, concat=True, negative_slope=0.01):
    """Plain-JAX reference mirroring the PyTorch forward (f32)."""
    src, dst = edge_index[0], edge_index[1]
    N = x.shape[0]
    outs = []
    for hh in range(Wt.shape[0]):
        h = x @ Wt[hh]
        h_src = h[src]
        h_dst = h[dst]
        attn_in = jnp.concatenate([h_src, h_dst], axis=1)
        e = (attn_in @ a[hh])[:, 0]
        e = jnp.where(e > 0, e, negative_slope * e)
        alpha = jax.nn.softmax(e, axis=0)
        hs = h_src * alpha[:, None]
        out_h = jnp.zeros_like(h).at[dst].add(hs)
        outs.append(out_h)
    out = jnp.concatenate(outs, axis=1)
    if concat:
        return out
    return out.reshape(N, Wt.shape[0], Wt.shape[2]).mean(axis=1)


if __name__ == "__main__":
    # Small deterministic problem; E > edge_tile so the online-softmax tiling
    # (multiple edge tiles + padded remainder) is actually exercised.
    N, in_dim, out_dim, num_heads, E = 64, 32, 16, 4, 300

    key = jax.random.PRNGKey(0)
    kx, ke, kw, ka = jax.random.split(key, 4)

    x = jax.random.normal(kx, (N, in_dim), dtype=jnp.float32)
    edge_index = jax.random.randint(ke, (2, E), 0, N, dtype=jnp.int32)

    # nn.Linear(in_dim, out_dim, bias=False).weight is [out_dim, in_dim]; stored here
    # transposed as [in_dim, out_dim].  attn_fc weight [1, 2*out_dim] stored as [2*out_dim, 1].
    Wt = jax.random.normal(kw, (num_heads, in_dim, out_dim), dtype=jnp.float32) / jnp.sqrt(in_dim)
    a = jax.random.normal(ka, (num_heads, 2 * out_dim, 1), dtype=jnp.float32) / jnp.sqrt(2 * out_dim)

    out = multi_head_gat_forward(x, edge_index, Wt, a, concat=True)
    out = jax.block_until_ready(out)

    ref = _reference_forward(x, edge_index, Wt, a, concat=True)
    ref = jax.block_until_ready(ref)

    assert out.shape == (N, num_heads * out_dim), out.shape
    # bf16 gather/scatter matmuls (f32 accumulate) + approx reciprocal => ~1% tolerance.
    assert jnp.allclose(out, ref, rtol=2e-2, atol=2e-2), (
        float(jnp.max(jnp.abs(out - ref))))

    print("KERNEL_OK")
</pallas_src>

<mosaic_0001>
module attributes {stable_mosaic.version = 11 : i64} {
  func.func @_gat_kernel(%arg0: i32, %arg1: memref<2x128xi32, #tpu.memory_space<vmem>>, %arg2: memref<64x32xf32, #tpu.memory_space<vmem>>, %arg3: memref<64x32xf32, #tpu.memory_space<vmem>>, %arg4: memref<4x64xf32, #tpu.memory_space<vmem>>, %arg5: memref<4x64xf32, #tpu.memory_space<vmem>>, %arg6: memref<64x4xf32, #tpu.memory_space<vmem>>, %arg7: memref<64x64xf32, #tpu.memory_space<vmem>>, %arg8: memref<64x64xbf16, #tpu.memory_space<vmem>>, %arg9: memref<4x64xbf16, #tpu.memory_space<vmem>>, %arg10: memref<64x64xf32, #tpu.memory_space<vmem>>, %arg11: memref<4x1xf32, #tpu.memory_space<vmem>>, %arg12: memref<4x1xf32, #tpu.memory_space<vmem>>) attributes {dimension_semantics = [#tpu.dimension_semantics<arbitrary>], iteration_bounds = array<i64: 3>, scalar_prefetch = 0 : i64, scratch_operands = 5 : i64, tpu.core_type = #tpu.core_type<tc>, window_params = [{transform_indices = @transform_0, window_bounds = array<i64: 2, 128>}, {pipeline_mode = #tpu.pipeline_mode<synchronous>, transform_indices = @transform_1, window_bounds = array<i64: 64, 32>}, {pipeline_mode = #tpu.pipeline_mode<synchronous>, transform_indices = @transform_2, window_bounds = array<i64: 64, 32>}, {pipeline_mode = #tpu.pipeline_mode<synchronous>, transform_indices = @transform_3, window_bounds = array<i64: 4, 64>}, {pipeline_mode = #tpu.pipeline_mode<synchronous>, transform_indices = @transform_4, window_bounds = array<i64: 4, 64>}, {pipeline_mode = #tpu.pipeline_mode<synchronous>, transform_indices = @transform_5, window_bounds = array<i64: 64, 4>}, {pipeline_mode = #tpu.pipeline_mode<synchronous>, transform_indices = @transform_6, window_bounds = array<i64: 64, 64>}]} {
    %c0_i32 = arith.constant 0 : i32
    %0 = arith.cmpi eq, %arg0, %c0_i32 : i32
    %1 = arith.extui %0 : i1 to i32
    %cst = arith.constant -1.000000e+30 : f32
    %c0_i32_0 = arith.constant 0 : i32
    %2 = arith.cmpi ne, %1, %c0_i32_0 : i32
    scf.if %2 {
      %c0_36 = arith.constant 0 : index
      %c0_37 = arith.constant 0 : index
      %74 = vector.load %arg3[%c0_36, %c0_37] : memref<64x32xf32, #tpu.memory_space<vmem>>, vector<64x32xf32>
      %c0_38 = arith.constant 0 : index
      %c0_39 = arith.constant 0 : index
      %75 = vector.load %arg2[%c0_38, %c0_39] : memref<64x32xf32, #tpu.memory_space<vmem>>, vector<64x32xf32>
      %cst_40 = arith.constant dense<0.000000e+00> : vector<64x64xf32>
      %76 = tpu.matmul %74, %75, %cst_40 {dimension_numbers = #tpu.dot_dimension_numbers<[1], [1], [0], [0], [0, 0, 1, 0], [], []>} : vector<64x32xf32>, vector<64x32xf32>, vector<64x64xf32> -> vector<64x64xf32>
      %77 = arith.truncf %76 : vector<64x64xf32> to vector<64x64xbf16>
      %c0_41 = arith.constant 0 : index
      %c0_42 = arith.constant 0 : index
      %78 = vector.load %arg8[%c0_41, %c0_42] : memref<64x64xbf16, #tpu.memory_space<vmem>>, vector<64x64xbf16>
      tpu.vector_store %arg8[%c0_41, %c0_42], %77 {strides = array<i32>} : memref<64x64xbf16, #tpu.memory_space<vmem>>, vector<64x64xbf16>,
      %c0_43 = arith.constant 0 : index
      %c0_44 = arith.constant 0 : index
      %79 = vector.load %arg5[%c0_43, %c0_44] : memref<4x64xf32, #tpu.memory_space<vmem>>, vector<4x64xf32>
      %cst_45 = arith.constant dense<0.000000e+00> : vector<4x64xf32>
      %80 = tpu.matmul %79, %76, %cst_45 {dimension_numbers = #tpu.dot_dimension_numbers<[1], [0], [0], [1], [0, 0, 1, 1], [], []>} : vector<4x64xf32>, vector<64x64xf32>, vector<4x64xf32> -> vector<4x64xf32>
      %81 = arith.truncf %80 : vector<4x64xf32> to vector<4x64xbf16>
      %c0_46 = arith.constant 0 : index
      %c0_47 = arith.constant 0 : index
      %82 = vector.load %arg9[%c0_46, %c0_47] : memref<4x64xbf16, #tpu.memory_space<vmem>>, vector<4x64xbf16>
      tpu.vector_store %arg9[%c0_46, %c0_47], %81 {strides = array<i32>} : memref<4x64xbf16, #tpu.memory_space<vmem>>, vector<4x64xbf16>,
      %cst_48 = arith.constant 0.000000e+00 : f32
      %83 = vector.broadcast %cst_48 : f32 to vector<64x64xf32>
      %c0_49 = arith.constant 0 : index
      %c0_50 = arith.constant 0 : index
      %84 = vector.load %arg10[%c0_49, %c0_50] : memref<64x64xf32, #tpu.memory_space<vmem>>, vector<64x64xf32>
      tpu.vector_store %arg10[%c0_49, %c0_50], %83 {strides = array<i32>} : memref<64x64xf32, #tpu.memory_space<vmem>>, vector<64x64xf32>,
      %85 = vector.broadcast %cst : f32 to vector<4x1xf32>
      %c0_51 = arith.constant 0 : index
      %c0_52 = arith.constant 0 : index
      %86 = vector.load %arg11[%c0_51, %c0_52] : memref<4x1xf32, #tpu.memory_space<vmem>>, vector<4x1xf32>
      tpu.vector_store %arg11[%c0_51, %c0_52], %85 {strides = array<i32>} : memref<4x1xf32, #tpu.memory_space<vmem>>, vector<4x1xf32>,
      %cst_53 = arith.constant 0.000000e+00 : f32
      %87 = vector.broadcast %cst_53 : f32 to vector<4x1xf32>
      %c0_54 = arith.constant 0 : index
      %c0_55 = arith.constant 0 : index
      %88 = vector.load %arg12[%c0_54, %c0_55] : memref<4x1xf32, #tpu.memory_space<vmem>>, vector<4x1xf32>
      tpu.vector_store %arg12[%c0_54, %c0_55], %87 {strides = array<i32>} : memref<4x1xf32, #tpu.memory_space<vmem>>, vector<4x1xf32>,
    } else {
    }
    %c0 = arith.constant 0 : index
    %c0_1 = arith.constant 0 : index
    %3 = vector.load %arg1[%c0, %c0_1] : memref<2x128xi32, #tpu.memory_space<vmem>>, vector<2x128xi32>
    %4 = vector.extract_strided_slice %3 {offsets = [0, 0], sizes = [1, 128], strides = [1, 1]} : vector<2x128xi32> to vector<1x128xi32>
    %5 = vector.extract_strided_slice %3 {offsets = [1, 0], sizes = [1, 128], strides = [1, 1]} : vector<2x128xi32> to vector<1x128xi32>
    %6 = tpu.iota {dimensions = array<i32: 0>} : vector<64x128xi32>
    %7 = vector.broadcast %4 : vector<1x128xi32> to vector<64x128xi32>
    %8 = arith.cmpi eq, %6, %7 : vector<64x128xi32>
    %9 = arith.extui %8 : vector<64x128xi1> to vector<64x128xi32>
    %10 = arith.sitofp %9 : vector<64x128xi32> to vector<64x128xf32>
    %11 = arith.truncf %10 : vector<64x128xf32> to vector<64x128xbf16>
    %12 = vector.broadcast %5 : vector<1x128xi32> to vector<64x128xi32>
    %13 = arith.cmpi eq, %6, %12 : vector<64x128xi32>
    %14 = arith.extui %13 : vector<64x128xi1> to vector<64x128xi32>
    %15 = arith.sitofp %14 : vector<64x128xi32> to vector<64x128xf32>
    %16 = arith.truncf %15 : vector<64x128xf32> to vector<64x128xbf16>
    %17 = tpu.iota {dimensions = array<i32: 1>} : vector<1x128xi32>
    %c128_i32 = arith.constant 128 : i32
    %18 = arith.muli %arg0, %c128_i32 : i32
    %19 = vector.broadcast %18 : i32 to vector<1x128xi32>
    %20 = arith.addi %17, %19 : vector<1x128xi32>
    %c300_i32 = arith.constant 300 : i32
    %21 = vector.broadcast %c300_i32 : i32 to vector<1x128xi32>
    %22 = arith.cmpi slt, %20, %21 : vector<1x128xi32>
    %c0_2 = arith.constant 0 : index
    %c0_3 = arith.constant 0 : index
    %23 = vector.load %arg8[%c0_2, %c0_3] : memref<64x64xbf16, #tpu.memory_space<vmem>>, vector<64x64xbf16>
    %cst_4 = arith.constant dense<0.000000e+00> : vector<64x128xf32>
    %24 = tpu.matmul %23, %11, %cst_4 {dimension_numbers = #tpu.dot_dimension_numbers<[1], [0], [0], [1], [0, 0, 1, 1], [], []>} : vector<64x64xbf16>, vector<64x128xbf16>, vector<64x128xf32> -> vector<64x128xf32>
    %c0_5 = arith.constant 0 : index
    %c0_6 = arith.constant 0 : index
    %25 = vector.load %arg4[%c0_5, %c0_6] : memref<4x64xf32, #tpu.memory_space<vmem>>, vector<4x64xf32>
    %cst_7 = arith.constant dense<0.000000e+00> : vector<4x128xf32>
    %26 = tpu.matmul %25, %24, %cst_7 {dimension_numbers = #tpu.dot_dimension_numbers<[1], [0], [0], [1], [0, 0, 1, 1], [], []>} : vector<4x64xf32>, vector<64x128xf32>, vector<4x128xf32> -> vector<4x128xf32>
    %c0_8 = arith.constant 0 : index
    %c0_9 = arith.constant 0 : index
    %27 = vector.load %arg9[%c0_8, %c0_9] : memref<4x64xbf16, #tpu.memory_space<vmem>>, vector<4x64xbf16>
    %cst_10 = arith.constant dense<0.000000e+00> : vector<4x128xf32>
    %28 = tpu.matmul %27, %16, %cst_10 {dimension_numbers = #tpu.dot_dimension_numbers<[1], [0], [0], [1], [0, 0, 1, 1], [], []>} : vector<4x64xbf16>, vector<64x128xbf16>, vector<4x128xf32> -> vector<4x128xf32>
    %29 = arith.addf %26, %28 : vector<4x128xf32>
    %cst_11 = arith.constant 0.000000e+00 : f32
    %30 = vector.broadcast %cst_11 : f32 to vector<4x128xf32>
    %31 = arith.cmpf ogt, %29, %30 : vector<4x128xf32>
    %cst_12 = arith.constant 0.00999999977 : f32
    %32 = vector.broadcast %cst_12 : f32 to vector<4x128xf32>
    %33 = arith.mulf %32, %29 : vector<4x128xf32>
    %34 = arith.select %31, %29, %33 : vector<4x128xi1>, vector<4x128xf32>
    %cst_13 = arith.constant -1.000000e+30 : f32
    %35 = vector.shape_cast %22 : vector<1x128xi1> to vector<1x128xi1>
    %36 = vector.broadcast %35 : vector<1x128xi1> to vector<4x128xi1>
    %37 = vector.broadcast %cst_13 : f32 to vector<4x128xf32>
    %38 = arith.select %36, %34, %37 : vector<4x128xi1>, vector<4x128xf32>
    %c0_14 = arith.constant 0 : index
    %c0_15 = arith.constant 0 : index
    %39 = vector.load %arg11[%c0_14, %c0_15] : memref<4x1xf32, #tpu.memory_space<vmem>>, vector<4x1xf32>
    %cst_16 = arith.constant dense<0xFF800000> : vector<4xf32>
    %40 = vector.multi_reduction <maximumf>, %38, %cst_16 [1] : vector<4x128xf32> to vector<4xf32>
    %41 = vector.shape_cast %40 : vector<4xf32> to vector<4x1xf32>
    %42 = arith.maximumf %39, %41 : vector<4x1xf32>
    %43 = arith.subf %39, %42 : vector<4x1xf32>
    %44 = math.exp %43 : vector<4x1xf32>
    %45 = vector.broadcast %42 : vector<4x1xf32> to vector<4x128xf32>
    %46 = arith.subf %38, %45 : vector<4x128xf32>
    %47 = math.exp %46 : vector<4x128xf32>
    %48 = arith.extui %22 : vector<1x128xi1> to vector<1x128xi32>
    %49 = arith.sitofp %48 : vector<1x128xi32> to vector<1x128xf32>
    %50 = vector.broadcast %49 : vector<1x128xf32> to vector<4x128xf32>
    %51 = arith.mulf %47, %50 : vector<4x128xf32>
    %c0_17 = arith.constant 0 : index
    %c0_18 = arith.constant 0 : index
    %52 = vector.load %arg12[%c0_17, %c0_18] : memref<4x1xf32, #tpu.memory_space<vmem>>, vector<4x1xf32>
    %53 = arith.mulf %52, %44 : vector<4x1xf32>
    %cst_19 = arith.constant dense<0.000000e+00> : vector<4xf32>
    %54 = vector.multi_reduction <add>, %51, %cst_19 [1] : vector<4x128xf32> to vector<4xf32>
    %55 = vector.shape_cast %54 : vector<4xf32> to vector<4x1xf32>
    %56 = arith.addf %53, %55 : vector<4x1xf32>
    %c0_20 = arith.constant 0 : index
    %c0_21 = arith.constant 0 : index
    %57 = vector.load %arg12[%c0_20, %c0_21] : memref<4x1xf32, #tpu.memory_space<vmem>>, vector<4x1xf32>
    tpu.vector_store %arg12[%c0_20, %c0_21], %56 {strides = array<i32>} : memref<4x1xf32, #tpu.memory_space<vmem>>, vector<4x1xf32>,
    %c0_22 = arith.constant 0 : index
    %c0_23 = arith.constant 0 : index
    %58 = vector.load %arg11[%c0_22, %c0_23] : memref<4x1xf32, #tpu.memory_space<vmem>>, vector<4x1xf32>
    tpu.vector_store %arg11[%c0_22, %c0_23], %42 {strides = array<i32>} : memref<4x1xf32, #tpu.memory_space<vmem>>, vector<4x1xf32>,
    %c0_24 = arith.constant 0 : index
    %c0_25 = arith.constant 0 : index
    %59 = vector.load %arg6[%c0_24, %c0_25] : memref<64x4xf32, #tpu.memory_space<vmem>>, vector<64x4xf32>
    %cst_26 = arith.constant dense<0.000000e+00> : vector<64x128xf32>
    %60 = tpu.matmul %59, %51, %cst_26 {dimension_numbers = #tpu.dot_dimension_numbers<[1], [0], [0], [1], [0, 0, 1, 1], [], []>} : vector<64x4xf32>, vector<4x128xf32>, vector<64x128xf32> -> vector<64x128xf32>
    %c0_27 = arith.constant 0 : index
    %c0_28 = arith.constant 0 : index
    %61 = vector.load %arg6[%c0_27, %c0_28] : memref<64x4xf32, #tpu.memory_space<vmem>>, vector<64x4xf32>
    %cst_29 = arith.constant dense<0.000000e+00> : vector<64x1xf32>
    %62 = tpu.matmul %61, %44, %cst_29 {dimension_numbers = #tpu.dot_dimension_numbers<[1], [0], [0], [1], [0, 0, 1, 1], [], []>} : vector<64x4xf32>, vector<4x1xf32>, vector<64x1xf32> -> vector<64x1xf32>
    %63 = arith.mulf %60, %24 : vector<64x128xf32>
    %64 = arith.truncf %63 : vector<64x128xf32> to vector<64x128xbf16>
    %cst_30 = arith.constant dense<0.000000e+00> : vector<64x64xf32>
    %65 = tpu.matmul %64, %16, %cst_30 {dimension_numbers = #tpu.dot_dimension_numbers<[1], [1], [0], [0], [0, 0, 1, 0], [], []>} : vector<64x128xbf16>, vector<64x128xbf16>, vector<64x64xf32> -> vector<64x64xf32>
    %c0_31 = arith.constant 0 : index
    %c0_32 = arith.constant 0 : index
    %66 = vector.load %arg10[%c0_31, %c0_32] : memref<64x64xf32, #tpu.memory_space<vmem>>, vector<64x64xf32>
    %67 = vector.broadcast %62 : vector<64x1xf32> to vector<64x64xf32>
    %68 = arith.mulf %66, %67 : vector<64x64xf32>
    %69 = arith.addf %68, %65 : vector<64x64xf32>
    %c0_33 = arith.constant 0 : index
    %c0_34 = arith.constant 0 : index
    %70 = vector.load %arg10[%c0_33, %c0_34] : memref<64x64xf32, #tpu.memory_space<vmem>>, vector<64x64xf32>
    tpu.vector_store %arg10[%c0_33, %c0_34], %69 {strides = array<i32>} : memref<64x64xf32, #tpu.memory_space<vmem>>, vector<64x64xf32>,
    %c2_i32 = arith.constant 2 : i32
    %71 = arith.cmpi eq, %arg0, %c2_i32 : i32
    %72 = arith.extui %71 : i1 to i32
    %c0_i32_35 = arith.constant 0 : i32
    %73 = arith.cmpi ne, %72, %c0_i32_35 : i32
    scf.if %73 {
      %c0_36 = arith.constant 0 : index
      %c0_37 = arith.constant 0 : index
      %74 = vector.load %arg12[%c0_36, %c0_37] : memref<4x1xf32, #tpu.memory_space<vmem>>, vector<4x1xf32>
      %75 = tpu.reciprocal %74 {approx = true} : vector<4x1xf32> -> vector<4x1xf32>
      %c0_38 = arith.constant 0 : index
      %c0_39 = arith.constant 0 : index
      %76 = vector.load %arg6[%c0_38, %c0_39] : memref<64x4xf32, #tpu.memory_space<vmem>>, vector<64x4xf32>
      %cst_40 = arith.constant dense<0.000000e+00> : vector<64x1xf32>
      %77 = tpu.matmul %76, %75, %cst_40 {dimension_numbers = #tpu.dot_dimension_numbers<[1], [0], [0], [1], [0, 0, 1, 1], [], []>} : vector<64x4xf32>, vector<4x1xf32>, vector<64x1xf32> -> vector<64x1xf32>
      %c0_41 = arith.constant 0 : index
      %c0_42 = arith.constant 0 : index
      %78 = vector.load %arg10[%c0_41, %c0_42] : memref<64x64xf32, #tpu.memory_space<vmem>>, vector<64x64xf32>
      %79 = vector.broadcast %77 : vector<64x1xf32> to vector<64x64xf32>
      %80 = arith.mulf %78, %79 : vector<64x64xf32>
      %c0_43 = arith.constant 0 : index
      %c0_44 = arith.constant 0 : index
      %81 = vector.load %arg7[%c0_43, %c0_44] : memref<64x64xf32, #tpu.memory_space<vmem>>, vector<64x64xf32>
      tpu.vector_store %arg7[%c0_43, %c0_44], %80 {strides = array<i32>} : memref<64x64xf32, #tpu.memory_space<vmem>>, vector<64x64xf32>,
    } else {
    }
    return
  }
  func.func @transform_0(%arg0: i32) -> (i32, i32) {
    %c0_i32 = arith.constant 0 : i32
    %c0_i32_0 = arith.constant 0 : i32
    return %c0_i32, %arg0 : i32, i32
  }
  func.func @transform_1(%arg0: i32) -> (i32, i32) {
    %c0_i32 = arith.constant 0 : i32
    %c0_i32_0 = arith.constant 0 : i32
    %c0_i32_1 = arith.constant 0 : i32
    return %c0_i32, %c0_i32_0 : i32, i32
  }
  func.func @transform_2(%arg0: i32) -> (i32, i32) {
    %c0_i32 = arith.constant 0 : i32
    %c0_i32_0 = arith.constant 0 : i32
    %c0_i32_1 = arith.constant 0 : i32
    return %c0_i32, %c0_i32_0 : i32, i32
  }
  func.func @transform_3(%arg0: i32) -> (i32, i32) {
    %c0_i32 = arith.constant 0 : i32
    %c0_i32_0 = arith.constant 0 : i32
    %c0_i32_1 = arith.constant 0 : i32
    return %c0_i32, %c0_i32_0 : i32, i32
  }
  func.func @transform_4(%arg0: i32) -> (i32, i32) {
    %c0_i32 = arith.constant 0 : i32
    %c0_i32_0 = arith.constant 0 : i32
    %c0_i32_1 = arith.constant 0 : i32
    return %c0_i32, %c0_i32_0 : i32, i32
  }
  func.func @transform_5(%arg0: i32) -> (i32, i32) {
    %c0_i32 = arith.constant 0 : i32
    %c0_i32_0 = arith.constant 0 : i32
    %c0_i32_1 = arith.constant 0 : i32
    return %c0_i32, %c0_i32_0 : i32, i32
  }
  func.func @transform_6(%arg0: i32) -> (i32, i32) {
    %c0_i32 = arith.constant 0 : i32
    %c0_i32_0 = arith.constant 0 : i32
    %c0_i32_1 = arith.constant 0 : i32
    return %c0_i32, %c0_i32_0 : i32, i32
  }
}

</mosaic_0001>

<bundles_post_ra>
// kernel: tpu_custom_call.1
= control target key start
LH: loop header
LB: loop body
LE: loop exit
PB: predicated region body
PF: predicated region fallthrough
CT: control target
= control target key end

     0   :  { %11 = vsyncpa [#allocation8], 0  ;;  %s2016_s21 = smov 0   ;;  %s2366_s0 = inlined_call_operand.vmem [shape: s32[2,384], index: 0, kind: input, shape index: {}]   ;;  %s2367_s1 = inlined_call_operand.vmem [shape: f32[64,32], index: 1, kind: input, shape index: {}]   ;;  %s2368_s2 = inlined_call_operand.vmem [shape: f32[64,32], index: 2, kind: input, shape index: {}]   ;;  %s2369_s3 = inlined_call_operand.vmem [shape: f32[4,64], index: 3, kind: input, shape index: {}]   ;;  %s2370_s4 = inlined_call_operand.vmem [shape: f32[4,64], index: 4, kind: input, shape index: {}]   ;;  %s2371_s5 = inlined_call_operand.vmem [shape: f32[64,4], index: 5, kind: input, shape index: {}]   ;;  %s2372_s6 = inlined_call_operand.hbm [shape: f32[64,64], index: 6, kind: output, shape index: {}]  }
   0x1 LB: > { %s2022_s22 = sadd.s32 4294967295, %s1968_s21   ;;  %p1537_p0 = scmp.ge.s32.totalorder %s1968_s21, 1  ;;  %s1968_s21 = sphi %s2016_s21, %s17_s21  }
   0x2   : > { %p207_p1 = scmp.lt.s32.totalorder %s1968_s21, 4 }
   0x4   : > { %p208_p2 = pnand %p1537_p0, %p207_p1 }
   0x5   : > { %p231_p3 = scmp.lt.s32.totalorder (!%p208_p2), %s2022_s22, 2  ;;  %p1539_p4 = scmp.ne.s32.totalorder (!%p208_p2), %s2022_s22, 0 }
   0x6   : > { %211 = sbr.rel (%p208_p2) target bundleno = 1973 (0x7b5), region = 44 }
   0xb   : > { %s232_s23 = scalar_select %p231_p3, %s2022_s22, 2 }
   0xc   : > { %239 = sbr.rel (%p1539_p4) target bundleno = 466 (0x1d2), region = 48 }
   0xd   : > { %s1538_s24 = sshll.u32 %s232_s23, 1 }
   0xe   : > { %s2031_s27 = scalar_lea.vmem %s2366_s0, %s1538_s24 }
  0x11   : > { %v255_v0 = vld [vmem:[%s2367_s1 + $0x38] sm:$0xff]  ;;  %vm256_vm0 = vcmask 261120   ;;  %v254_v1 = vld [vmem:[%s2367_s1 + $0x30] sm:$0xff]  ;;  %v240_v2 = vld [vmem:[%s2368_s2] sm:$0xff]  ;;  %v1970_v16 = vmov 0.0   ;;  %vm537_vm1 = vcmask 3072  }
  0x12   : > { %1739 = vmatprep.subr.msk.mxu0 %vm256_vm0, %v255_v0  ;;  %1755 = vmatprep.mubr.msk.f32.mxu0 %vm256_vm0, %v240_v2  ;;  %v253_v3 = vld [vmem:[%s2367_s1 + $0x28] sm:$0xff]  ;;  %v252_v4 = vld [vmem:[%s2367_s1 + $0x20] sm:$0xff]  ;;  %v251_v5 = vld [vmem:[%s2367_s1 + $0x18] sm:$0xff]  ;;  %v1971_v17 = vmov -1e+30   ;;  %vm1972_vm2 = vmmov 0  }
  0x13   : > { %1740 = vmatpush3.xpose.msk.msra.mxu0 %vm256_vm0, %v255_v0  ;;  %v250_v6 = vld [vmem:[%s2367_s1 + $0x10] sm:$0xff]  ;;  %v249_v7 = vld [vmem:[%s2367_s1 + $0x8] sm:$0xff]  ;;  %v248_v8 = vld [vmem:[%s2367_s1] sm:$0xff]  ;;  %1767 = vmatprep.subr.mxu1 %v1970_v16  ;;  %538 = vst.msk [vmem:[#allocation5] sm:$0xf] %vm537_vm1, %v1971_v17  ;;  %vm452_vm3 = vcmask 523264  }
  0x14   : > { %1741 = vmatprep.subr.msk.mxu0 %vm256_vm0, %v254_v1  ;;  %v241_v9 = vld [vmem:[%s2368_s2 + $0x8] sm:$0xff]  ;;  %v242_v10 = vld [vmem:[%s2368_s2 + $0x10] sm:$0xff]  ;;  %v243_v11 = vld [vmem:[%s2368_s2 + $0x18] sm:$0xff]  ;;  %539 = vst.msk [vmem:[#allocation6] sm:$0xf] %vm537_vm1, %v1970_v16  ;;  %1783 = vmatprep.mubr.msk.f32.mxu1 %vm1972_vm2, %v1970_v16  ;;  %vm442_vm4 = vcmask 519168  }
  0x15   : > { %v244_v12 = vld [vmem:[%s2368_s2 + $0x20] sm:$0xff]  ;;  %v245_v13 = vld [vmem:[%s2368_s2 + $0x28] sm:$0xff]  ;;  %v246_v14 = vld [vmem:[%s2368_s2 + $0x30] sm:$0xff]  ;;  %529 = vst.msk [vmem:[#allocation4] sm:$0xff] %vm452_vm3, %v1970_v16  ;;  %vm527_vm5 = vcmask 517120  }
  0x16   : > { %v247_v15 = vld [vmem:[%s2368_s2 + $0x38] sm:$0xff]  ;;  %530 = vst.msk [vmem:[#allocation4 + $0x8] sm:$0xff] %vm452_vm3, %v1970_v16  ;;  %531 = vst.msk [vmem:[#allocation4 + $0x10] sm:$0xff] %vm452_vm3, %v1970_v16  ;;  %v451_v34 = vld [vmem:[%s2370_s4] sm:$0xf] }
  0x17   : > { %1742 = vmatpush3.xpose.msk.msra.mxu0 %vm256_vm0, %v254_v1  ;;  %532 = vst.msk [vmem:[#allocation4 + $0x18] sm:$0xff] %vm452_vm3, %v1970_v16  ;;  %533 = vst.msk [vmem:[#allocation4 + $0x20] sm:$0xff] %vm452_vm3, %v1970_v16 }
  0x18   : > { %1743 = vmatprep.subr.msk.mxu0 %vm256_vm0, %v253_v3  ;;  %534 = vst.msk [vmem:[#allocation4 + $0x28] sm:$0xff] %vm452_vm3, %v1970_v16  ;;  %535 = vst.msk [vmem:[#allocation4 + $0x30] sm:$0xff] %vm452_vm3, %v1970_v16 }
  0x19   : > { %536 = vst.msk [vmem:[#allocation4 + $0x38] sm:$0xff] %vm452_vm3, %v1970_v16 }
  0x1b   : > { %1744 = vmatpush3.xpose.msk.msra.mxu0 %vm256_vm0, %v253_v3 }
  0x1c   : > { %1745 = vmatprep.subr.msk.mxu0 %vm256_vm0, %v252_v4 }
  0x1f   : > { %1746 = vmatpush3.xpose.msk.msra.mxu0 %vm256_vm0, %v252_v4 }
  0x20   : > { %1747 = vmatprep.subr.msk.mxu0 %vm256_vm0, %v251_v5 }
  0x23   : > { %1748 = vmatpush3.xpose.msk.msra.mxu0 %vm256_vm0, %v251_v5 }
  0x24   : > { %1749 = vmatprep.subr.msk.mxu0 %vm256_vm0, %v250_v6 }
  0x27   : > { %1750 = vmatpush3.xpose.msk.msra.mxu0 %vm256_vm0, %v250_v6 }
  0x28   : > { %1751 = vmatprep.subr.msk.mxu0 %vm256_vm0, %v249_v7 }
  0x2b   : > { %1752 = vmatpush3.xpose.msk.msra.mxu0 %vm256_vm0, %v249_v7 }
  0x2c   : > { %1753 = vmatprep.subr.msk.mxu0 %vm256_vm0, %v248_v8 }
  0x2f   : > { %1754 = vmatpush3.xpose.msk.msra.mxu0 %vm256_vm0, %v248_v8 }
  0x32   : > { %1756 = vmatmul.mubr.msk.f32.vlgmr.msra.gmra.mxu0 %vm256_vm0, %v241_v9 }
  0x33   : > { %1758 = vmatprep.mubr.msk.f32.mxu0 %vm256_vm0, %v242_v10 }
  0x36   : > { %1759 = vmatmul.mubr.msk.f32.gmra.mxu0 %vm256_vm0, %v243_v11 }
  0x37   : > { %1761 = vmatprep.mubr.msk.f32.mxu0 %vm256_vm0, %v244_v12 }
  0x3a   : > { %1762 = vmatmul.mubr.msk.f32.gmra.mxu0 %vm256_vm0, %v245_v13 }
  0x3b   : > { %1764 = vmatprep.mubr.msk.f32.mxu0 %vm256_vm0, %v246_v14 }
  0x3e   : > { %1765 = vmatmul.mubr.msk.f32.gmra.mxu0 %vm256_vm0, %v247_v15 }
  0xf2   : > { %v1757_v18 = vpop.f32.mrf.mxu0 }
  0xf3   : > { %v1650_v19 = vpack.c.bf16 %v1757_v18, %v1757_v18 }
  0xf4   : > { %v371_v20 = vpop.f32.mrf.mxu0 }
  0xf5   : > { %444 = vst.msk [vmem:[#allocation2 + $0x4] sm:$0xf] %vm442_vm4, %v1650_v19  ;;  %v1649_v21 = vpack.c.bf16 %v371_v20, %v371_v20 }
  0xf6   : > { %v1760_v22 = vpop.f32.mrf.mxu0 }
  0xf7   : > { %443 = vst.msk [vmem:[#allocation2] sm:$0xf] %vm442_vm4, %v1649_v21  ;;  %v1652_v23 = vpack.c.bf16 %v1760_v22, %v1760_v22 }
  0xf8   : > { %v381_v24 = vpop.f32.mrf.mxu0 }
  0xf9   : > { %446 = vst.msk [vmem:[#allocation2 + $0xc] sm:$0xf] %vm442_vm4, %v1652_v23  ;;  %v1651_v25 = vpack.c.bf16 %v381_v24, %v381_v24 }
  0xfa   : > { %v1763_v26 = vpop.f32.mrf.mxu0 }
  0xfb   : > { %445 = vst.msk [vmem:[#allocation2 + $0x8] sm:$0xf] %vm442_vm4, %v1651_v25  ;;  %v1654_v27 = vpack.c.bf16 %v1763_v26, %v1763_v26 }
  0xfc   : > { %v391_v28 = vpop.f32.mrf.mxu0 }
  0xfd   : > { %448 = vst.msk [vmem:[#allocation2 + $0x14] sm:$0xf] %vm442_vm4, %v1654_v27  ;;  %v1653_v29 = vpack.c.bf16 %v391_v28, %v391_v28 }
  0xfe   : > { %v1766_v30 = vpop.f32.mrf.mxu0 }
  0xff   : > { %447 = vst.msk [vmem:[#allocation2 + $0x10] sm:$0xf] %vm442_vm4, %v1653_v29  ;;  %v1656_v31 = vpack.c.bf16 %v1766_v30, %v1766_v30  ;;  %1768 = vmatpush3.msra.mxu1 %v1766_v30 }
 0x100   : > { %v401_v32 = vpop.f32.mrf.mxu0  ;;  %1769 = vmatprep.subr.mxu1 %v1970_v16 }
 0x101   : > { %450 = vst.msk [vmem:[#allocation2 + $0x1c] sm:$0xf] %vm442_vm4, %v1656_v31  ;;  %v1655_v33 = vpack.c.bf16 %v401_v32, %v401_v32  ;;  %1770 = vmatpush3.msra.mxu1 %v401_v32 }
 0x102   : > { %1771 = vmatprep.subr.mxu1 %v1970_v16 }
 0x103   : > { %449 = vst.msk [vmem:[#allocation2 + $0x18] sm:$0xf] %vm442_vm4, %v1655_v33  ;;  %1772 = vmatpush3.msra.mxu1 %v1763_v26 }
 0x104   : > { %1773 = vmatprep.subr.mxu1 %v1970_v16 }
 0x105   : > { %1774 = vmatpush3.msra.mxu1 %v391_v28 }
 0x106   : > { %1775 = vmatprep.subr.mxu1 %v1970_v16 }
 0x107   : > { %1776 = vmatpush3.msra.mxu1 %v1760_v22 }
 0x108   : > { %1777 = vmatprep.subr.mxu1 %v1970_v16 }
 0x109   : > { %1778 = vmatpush3.msra.mxu1 %v381_v24 }
 0x10a   : > { %1779 = vmatprep.subr.mxu1 %v1970_v16 }
 0x10b   : > { %1780 = vmatpush3.msra.mxu1 %v1757_v18 }
 0x10c   : > { %1781 = vmatprep.subr.mxu1 %v1970_v16 }
 0x10d   : > { %1782 = vmatpush3.msra.mxu1 %v371_v20 }
 0x10e   : > { %1784 = vmatmul.mubr.msk.f32.vlgmr.msra.gmra.mxu1 %vm452_vm3, %v451_v34 }
 0x1ce   : > { %v522_v35 = vpop.f32.mrf.mxu1 }
 0x1cf   : > { %v526_v36 = vpack.c.bf16 %v522_v35, %v522_v35 }
 0x1d0   : > { %v1785_v37 = vpop.f32.mrf.mxu1 }
 0x1d1   : > { %528 = vst.msk [vmem:[#allocation3] sm:$0x3] %vm527_vm5, %v526_v36 }
 0x1d2 PF: > { %v541_v38 = vlaneseq  ;;  %v1922_v39 = vld [vmem:[#allocation2] sm:$0xff]   ;;  %vm648_vm6 = vcmask 523264   ;;  %v1973_v50 = vmov 1.0|1.0   ;;  %v1923_v54 = vld [vmem:[#allocation2 + $0x8] sm:$0xff]   ;;  %v1924_v55 = vld [vmem:[#allocation2 + $0x10] sm:$0xff]  }
 0x1d3   : > { %v540_v41 = vld [vmem:[%s2031_s27] sm:$0x3]  ;;  %1794 = vmatprep.mubr.msk.bf16.mxu0 %vm648_vm6, %v1922_v39  ;;  %v1974_v56 = vmov 0.0   ;;  %v1925_v59 = vld [vmem:[#allocation2 + $0x18] sm:$0xff]   ;;  %s1581_s18 = sshll.u32 %s2022_s22, 7  ;;  %v1976_v22 = vmov 0  }
 0x1d4   : > { %v542_v40 = vshrl.u32 %v541_v38, 7  ;;  %v726_v7 = vld [vmem:[%s2369_s3] sm:$0xf]  ;;  %v615_v12 = vand.u32 127, %v541_v38  ;;  %v617_v13 = vstv %s1581_s18  ;;  %1920 = vset.pattern.permute.xlu0 %v1976_v22  ;;  %1921 = vset.pattern.permute.xlu1 %v1976_v22  ;;  %v880_v28 = vld [vmem:[%s2371_s5 + $0x10] sm:$0xff]  ;;  %v879_v36 = vld [vmem:[%s2371_s5 + $0x8] sm:$0xff] }
 0x1d5   : > { %v850_v23 = vld [vmem:[#allocation5] sm:$0xf]  ;;  %v881_v38 = vld [vmem:[%s2371_s5 + $0x18] sm:$0xff]  ;;  %p1635_p5 = scmp.ne.s32.totalorder %s2022_s22, 2 }
 0x1d6   : > { %v548_v42 = vadd.s32 48, %v542_v40  ;;  %v549_v43 = vadd.s32 56, %v542_v40  ;;  %v552_v44 = vsub.s32 0, %v542_v40  ;;  %v546_v45 = vadd.s32 32, %v542_v40  ;;  %v878_v27 = vld [vmem:[%s2371_s5] sm:$0xff] }
 0x1d7   : > { %v547_v46 = vadd.s32 40, %v542_v40  ;;  %v544_v48 = vadd.s32 16, %v542_v40  ;;  %v545_v49 = vadd.s32 24, %v542_v40  ;;  %v543_v51 = vadd.s32 8, %v542_v40  ;;  %v882_v39 = vld [vmem:[%s2371_s5 + $0x20] sm:$0xff] }
 0x1d8   : > { %v553_v47 = vrot.slane %v540_v41, %v552_v44  ;;  %v584_v52 = vsub.s32 1, %v542_v40  ;;  %v727_v62 = vld [vmem:[#allocation3] sm:$0x3]  ;;  %v618_v14 = vadd.s32 %v617_v13, %v615_v12  ;;  %v869_v44 = vld [vmem:[#allocation6] sm:$0xf] }
 0x1da   : > { %vm560_vm7 = vcmp.eq.s32.totalorder %v548_v42, %v553_v47  ;;  %vm561_vm8 = vcmp.eq.s32.totalorder %v549_v43, %v553_v47  ;;  %vm558_vm10 = vcmp.eq.s32.totalorder %v546_v45, %v553_v47  ;;  %vm559_vm11 = vcmp.eq.s32.totalorder %v547_v46, %v553_v47 }
 0x1db   : > { %vm1586_vm9 = vmpackc.low %vm561_vm8, %vm560_vm7  ;;  %vm556_vm13 = vcmp.eq.s32.totalorder %v544_v48, %v553_v47  ;;  %vm557_vm14 = vcmp.eq.s32.totalorder %v545_v49, %v553_v47  ;;  %vm554_vm0 = vcmp.eq.s32.totalorder %v542_v40, %v553_v47  ;;  %vm555_vm1 = vcmp.eq.s32.totalorder %v543_v51, %v553_v47 }
 0x1dc   : > { %1786 = vmatprep.subr.msk.bf16.mxu0 %vm1586_vm9, %v1973_v50  ;;  %vm1588_vm12 = vmpackc.low %vm559_vm11, %vm558_vm10  ;;  %v585_v53 = vrot.slane %v540_v41, %v584_v52  ;;  %v883_v41 = vld [vmem:[%s2371_s5 + $0x28] sm:$0xff] }
 0x1dd   : > { %1787 = vmatpush3.bf16.msk.msra.mxu0 %vm1586_vm9, %v1973_v50  ;;  %vm1590_vm15 = vmpackc.low %vm557_vm14, %vm556_vm13 }
 0x1de   : > { %1788 = vmatprep.subr.msk.bf16.mxu0 %vm1588_vm12, %v1973_v50  ;;  %vm1592_vm2 = vmpackc.low %vm555_vm1, %vm554_vm0  ;;  %vm592_vm3 = vcmp.eq.s32.totalorder %v548_v42, %v585_v53  ;;  %vm593_vm4 = vcmp.eq.s32.totalorder %v549_v43, %v585_v53  ;;  %vm590_vm7 = vcmp.eq.s32.totalorder %v546_v45, %v585_v53  ;;  %vm591_vm8 = vcmp.eq.s32.totalorder %v547_v46, %v585_v53  ;;  %v884_v42 = vld [vmem:[%s2371_s5 + $0x30] sm:$0xff]  ;;  %v885_v43 = vld [vmem:[%s2371_s5 + $0x38] sm:$0xff] }
 0x1df   : > { %vm2138_vm5 = vmpackc.low %vm593_vm4, %vm592_vm3  ;;  %vm588_vm10 = vcmp.eq.s32.totalorder %v544_v48, %v585_v53  ;;  %vm589_vm11 = vcmp.eq.s32.totalorder %v545_v49, %v585_v53  ;;  %vm586_vm13 = vcmp.eq.s32.totalorder %v542_v40, %v585_v53  ;;  %vm587_vm14 = vcmp.eq.s32.totalorder %v543_v51, %v585_v53 }
 0x1e0   : > { %vm2148_vm9 = vmpackc.low %vm591_vm8, %vm590_vm7  ;;  %vm1975_vm0 = vmmov 0   ;;  %vm619_vm1 = vcmp.lt.s32.totalorder %v618_v14, 300  ;;  %vm851_vm3 = vcmask 1043456   ;;  %vm875_vm4 = vcmask 3072  }
 0x1e1   : > { %1789 = vmatpush3.bf16.msk.msra.mxu0 %vm1588_vm12, %v1973_v50  ;;  %vm2157_vm12 = vmpackc.low %vm589_vm11, %vm588_vm10  ;;  %vm886_vm7 = vcmask 31744   ;;  %v1608_v33 = vsel %vm619_vm1, 1.0, %v1974_v56 }
 0x1e2   : > { %1790 = vmatprep.subr.msk.bf16.mxu0 %vm1590_vm15, %v1973_v50  ;;  %1838 = vmatprep.mubr.msk.f32.mxu1 %vm886_vm7, %v880_v28 }
 0x1e5   : > { %1791 = vmatpush3.bf16.msk.msra.mxu0 %vm1590_vm15, %v1973_v50  ;;  %vm2165_vm15 = vmpackc.low %vm587_vm14, %vm586_vm13 }
 0x1e6   : > { %1792 = vmatprep.subr.msk.bf16.mxu0 %vm1592_vm2, %v1973_v50 }
 0x1e9   : > { %1793 = vmatpush3.bf16.msk.msra.mxu0 %vm1592_vm2, %v1973_v50 }
 0x1ea   : > { %1802 = vmatprep.subr.bf16.mxu0 %v1974_v56 }
 0x1ec   : > { %1795 = vmatmul.mubr.msk.bf16.vlgmr.msra.gmra.mxu0 %vm648_vm6, %v1923_v54 }
 0x1ed   : > { %1798 = vmatprep.mubr.msk.bf16.mxu0 %vm648_vm6, %v1924_v55  ;;  %1803 = vmatpush3.bf16.msk.msra.mxu0 %vm2138_vm5, %v1973_v50 }
 0x1ee   : > { %1804 = vmatprep.subr.bf16.mxu0 %v1974_v56 }
 0x1f1   : > { %1805 = vmatpush3.bf16.msk.msra.mxu0 %vm2148_vm9, %v1973_v50 }
 0x1f2   : > { %1806 = vmatprep.subr.bf16.mxu0 %v1974_v56 }
 0x1f4   : > { %1799 = vmatmul.mubr.msk.bf16.gmra.mxu0 %vm648_vm6, %v1925_v59 }
 0x1f5   : > { %1807 = vmatpush3.bf16.msk.msra.mxu0 %vm2157_vm12, %v1973_v50  ;;  %1810 = vmatprep.mubr.msk.bf16.mxu0 %vm1975_vm0, %v1974_v56 }
 0x1f6   : > { %1808 = vmatprep.subr.bf16.mxu0 %v1974_v56 }
 0x1f9   : > { %1809 = vmatpush3.bf16.msk.msra.mxu0 %vm2165_vm15, %v1973_v50 }
 0x1fa   : > { %1814 = vmatprep.subr.mxu0 %v1974_v56 }
 0x1fc   : > { %1811 = vmatmul.mubr.msk.bf16.vlgmr.msra.gmra.mxu0 %vm648_vm6, %v727_v62 }
 0x1fd   : > { %1830 = vmatprep.mubr.msk.f32.mxu0 %vm1975_vm0, %v1974_v56 }
 0x2ac   : > { %v2176_v63 = vpop.f32.mrf.mxu0 }
 0x2ae   : > { %v2178_v0 = vpop.f32.mrf.mxu0 }
 0x2b0   : > { %v2180_v1 = vpop.f32.mrf.mxu0 }
 0x2b2   : > { %v2182_v2 = vpop.f32.mrf.mxu0 }
 0x2b4   : > { %v2184_v3 = vpop.f32.mrf.mxu0 }
 0x2b6   : > { %v2186_v4 = vpop.f32.mrf.mxu0 }
 0x2b8   : > { %v2188_v5 = vpop.f32.mrf.mxu0 }
 0x2b9   : > { %1815 = vmatpush3.msra.mxu0 %v2188_v5 }
 0x2ba   : > { %1816 = vmatprep.subr.mxu0 %v1974_v56  ;;  %v2193_v6 = vpop.f32.mrf.mxu0 }
 0x2bb   : > { %1817 = vmatpush3.msra.mxu0 %v2184_v3 }
 0x2bc   : > { %1818 = vmatprep.subr.mxu0 %v1974_v56  ;;  %v765_v8 = vpop.f32.mrf.mxu0 }
 0x2bd   : > { %1819 = vmatpush3.msra.mxu0 %v2193_v6 }
 0x2be   : > { %1820 = vmatprep.subr.mxu0 %v1974_v56  ;;  %v1812_v9 = vpop.f32.mrf.mxu0 }
 0x2bf   : > { %1821 = vmatpush3.msra.mxu0 %v2186_v4 }
 0x2c0   : > { %1822 = vmatprep.subr.mxu0 %v1974_v56  ;;  %v768_v10 = vpop.f32.mrf.mxu0 }
 0x2c1   : > { %1823 = vmatpush3.msra.mxu0 %v2180_v1 }
 0x2c2   : > { %1824 = vmatprep.subr.mxu0 %v1974_v56  ;;  %v1813_v11 = vpop.f32.mrf.mxu0 }
 0x2c3   : > { %1825 = vmatpush3.msra.mxu0 %v2176_v63 }
 0x2c4   : > { %1826 = vmatprep.subr.mxu0 %v1974_v56 }
 0x2c5   : > { %1827 = vmatpush3.msra.mxu0 %v2182_v2 }
 0x2c6   : > { %1828 = vmatprep.subr.mxu0 %v1974_v56 }
 0x2c7   : > { %1829 = vmatpush3.msra.mxu0 %v2178_v0 }
 0x2c8   : > { %1831 = vmatmul.mubr.msk.f32.vlgmr.msra.gmra.mxu0 %vm648_vm6, %v726_v7 }
 0x2c9   : > { %1835 = vmatprep.mubr.msk.f32.mxu0 %vm886_vm7, %v878_v27 }
 0x388   : > { %v840_v15 = vpop.f32.mrf.mxu0 }
 0x389   : > { %v841_v16 = vadd.f32 %v840_v15, %v765_v8 }
 0x38a   : > { %v1832_v17 = vpop.f32.mrf.mxu0 }
 0x38b   : > { %v845_v18 = vmul.f32 0.01, %v841_v16  ;;  %vm844_vm2 = vcmp.gt.f32.partialorder %v841_v16, 0.0  ;;  %v1206_v17 = vld [vmem:[#allocation4 + $0x10] sm:$0xff] }
 0x38d   : > { %v846_v19 = vsel %vm844_vm2, %v841_v16, %v845_v18 }
 0x38e   : > { %v849_v20 = vsel %vm619_vm1, %v846_v19, -1e+30  ;;  %v1204_v19 = vld [vmem:[#allocation4] sm:$0xff] }
 0x38f   : > { %v852_v21 = vsel %vm851_vm3, %v849_v20, -inf }
 0x390   : > { %853 = vmax.xlane.f32.xlu0 %v852_v21  ;;  %v1207_v21 = vld [vmem:[#allocation4 + $0x18] sm:$0xff] }
 0x419   : > { %v854_v24 = vpop.xlane.xlu0 %853 }
 0x41a   : > { %v855_v25 = vmax.f32 %v850_v23, %v854_v24 }
 0x41c   : > { %v856_v26 = vsub.f32 %v850_v23, %v855_v25  ;;  %877 = vst.msk [vmem:[#allocation5] sm:$0xf] %vm875_vm4, %v855_v25  ;;  %861 = vperm.xlu0 %1920, %v855_v25   ;;  %v1205_v25 = vld [vmem:[#allocation4 + $0x8] sm:$0xff] }
 0x41e   : > { %v857_v32 = vmul.f32 1.442695, %v856_v26 }
 0x497   : > { %v862_v29 = vpop.permute.xlu0 %861 }
 0x498   : > { %v864_v30 = vsub.f32 %v849_v20, %v862_v29 }
 0x49a   : > { %v865_v31 = vmul.f32 1.442695, %v864_v30  ;;  %v1210_v30 = vld [vmem:[#allocation4 + $0x30] sm:$0xff] }
 0x49c   : > { %1926 = vpow2.f32 %v865_v31 }
 0x49d   : > { %1928 = vpow2.f32 %v857_v32 }
 0x4a9   : > { %v1927_v34 = vpop.eup %1926 }
 0x4aa   : > { %v868_v35 = vmul.f32 %v1927_v34, %v1608_v33  ;;  %v1929_v40 = vpop.eup %1928  ;;  %v1208_v34 = vld [vmem:[#allocation4 + $0x20] sm:$0xff] }
 0x4ab   : > { %v870_v45 = vmul.f32 %v1929_v40, %v869_v44 }
 0x4ac   : > { %1833 = vmatprep.subr.msk.mxu0 %vm851_vm3, %v868_v35  ;;  %1891 = vmatprep.subr.msk.mxu1 %vm851_vm3, %v868_v35  ;;  %v871_v37 = vsel %vm851_vm3, %v868_v35, 0.0 }
 0x4ad   : > { %1834 = vmatpush3.msk.msra.mxu0 %vm851_vm3, %v868_v35  ;;  %1892 = vmatpush3.msk.msra.mxu1 %vm851_vm3, %v868_v35 }
 0x4ae   : > { %872 = vadd.xlane.f32.xlu1 %v871_v37  ;;  %1836 = vmatmul.mubr.msk.f32.vlgmr.msra.gmra.mxu0 %vm886_vm7, %v879_v36 }
 0x4af   : > { %1839 = vmatmul.mubr.msk.f32.vlgmr.msra.gmra.mxu1 %vm886_vm7, %v881_v38  ;;  %1847 = vmatprep.subr.msk.mxu1 %vm851_vm3, %v1929_v40 }
 0x4b0   : > { %1848 = vmatpush3.msk.msra.mxu1 %vm851_vm3, %v1929_v40  ;;  %1841 = vmatprep.mubr.msk.f32.mxu1 %vm886_vm7, %v882_v39 }
 0x4b1   : > { %1861 = vmatprep.subr.msk.bf16.mxu1 %vm2138_vm5, %v1973_v50 }
 0x4b3   : > { %1842 = vmatmul.mubr.msk.f32.gmra.mxu1 %vm886_vm7, %v883_v41 }
 0x4b4   : > { %1844 = vmatprep.mubr.msk.f32.mxu1 %vm886_vm7, %v884_v42 }
 0x4b7   : > { %1845 = vmatmul.mubr.msk.f32.gmra.mxu1 %vm886_vm7, %v885_v43 }
 0x4b8   : > { %1849 = vmatprep.mubr.msk.f32.mxu1 %vm886_vm7, %v878_v27 }
 0x4bb   : > { %1850 = vmatmul.mubr.msk.f32.vlgmr.msra.gmra.mxu1 %vm886_vm7, %v879_v36 }
 0x4bc   : > { %1852 = vmatprep.mubr.msk.f32.mxu1 %vm886_vm7, %v880_v28  ;;  %1862 = vmatpush3.bf16.xpose.msk.msra.mxu1 %vm2138_vm5, %v1973_v50 }
 0x4bd   : > { %1863 = vmatprep.subr.msk.bf16.mxu1 %vm2148_vm9, %v1973_v50 }
 0x4bf   : > { %1853 = vmatmul.mubr.msk.f32.gmra.mxu1 %vm886_vm7, %v881_v38  ;;  %v1211_v38 = vld [vmem:[#allocation4 + $0x38] sm:$0xff] }
 0x4c0   : > { %1855 = vmatprep.mubr.msk.f32.mxu1 %vm886_vm7, %v882_v39 }
 0x4c3   : > { %1856 = vmatmul.mubr.msk.f32.gmra.mxu1 %vm886_vm7, %v883_v41 }
 0x4c4   : > { %1858 = vmatprep.mubr.msk.f32.mxu1 %vm886_vm7, %v884_v42  ;;  %1864 = vmatpush3.bf16.xpose.msk.msra.mxu1 %vm2148_vm9, %v1973_v50 }
 0x4c5   : > { %1865 = vmatprep.subr.msk.bf16.mxu1 %vm2157_vm12, %v1973_v50 }
 0x4c7   : > { %1859 = vmatmul.mubr.msk.f32.gmra.mxu1 %vm886_vm7, %v885_v43  ;;  %v1209_v43 = vld [vmem:[#allocation4 + $0x28] sm:$0xff] }
 0x4cc   : > { %1866 = vmatpush3.bf16.xpose.msk.msra.mxu1 %vm2157_vm12, %v1973_v50 }
 0x4cd   : > { %1867 = vmatprep.subr.msk.bf16.mxu1 %vm2165_vm15, %v1973_v50 }
 0x4d4   : > { %1868 = vmatpush3.bf16.xpose.msk.msra.mxu1 %vm2165_vm15, %v1973_v50 }
 0x537   : > { %v873_v46 = vpop.xlane.xlu1 %872 }
 0x538   : > { %v874_v47 = vadd.f32 %v873_v46, %v870_v45 }
 0x53a   : > { %876 = vst.msk [vmem:[#allocation6] sm:$0xf] %vm875_vm4, %v874_v47 }
 0x56e   : > { %v1837_v48 = vpop.f32.mrf.mxu0 }
 0x56f   : > { %v1840_v49 = vpop.f32.mrf.mxu1  ;;  %v1128_v52 = vmul.f32 %v1837_v48, %v2182_v2 }
 0x570   : > { %v980_v51 = vpop.f32.mrf.mxu0  ;;  %v1130_v55 = vmul.f32 %v1840_v49, %v2180_v1 }
 0x571   : > { %v1127_v53 = vmul.f32 %v980_v51, %v2178_v0  ;;  %v990_v54 = vpop.f32.mrf.mxu1 }
 0x572   : > { %v1129_v56 = vmul.f32 %v2176_v63, %v990_v54 }
 0x573   : > { %v1135_v57 = vpack.c.bf16 %v1128_v52, %v1127_v53  ;;  %v1843_v50 = vpop.f32.mrf.mxu1 }
 0x574   : > { %v1136_v58 = vpack.c.bf16 %v1130_v55, %v1129_v56  ;;  %v1132_v60 = vmul.f32 %v1843_v50, %v2193_v6 }
 0x575   : > { %v1000_v59 = vpop.f32.mrf.mxu1  ;;  %1869 = vmatprep.mubr.bf16.mxu1 %v1135_v57 }
 0x576   : > { %v1131_v61 = vmul.f32 %v1000_v59, %v2186_v4  ;;  %1870 = vmatmul.mubr.bf16.vlgmr.msra.gmra.mxu1 %v1136_v58 }
 0x577   : > { %v1846_v62 = vpop.f32.mrf.mxu1 }
 0x578   : > { %v1137_v7 = vpack.c.bf16 %v1132_v60, %v1131_v61  ;;  %v1134_v0 = vmul.f32 %v1846_v62, %v2188_v5 }
 0x579   : > { %v1010_v2 = vpop.f32.mrf.mxu1 }
 0x57a   : > { %v1133_v8 = vmul.f32 %v2184_v3, %v1010_v2  ;;  %1873 = vmatprep.mubr.bf16.mxu1 %v1137_v7 }
 0x57b   : > { %v1851_v1 = vpop.f32.mrf.mxu1 }
 0x57c   : > { %v1138_v63 = vpack.c.bf16 %v1134_v0, %v1133_v8  ;;  %1219 = vperm.xlu1 %1921, %v1851_v1  }
 0x57d   : > { %v1088_v9 = vpop.f32.mrf.mxu1 }
 0x57e   : > { %1874 = vmatmul.mubr.bf16.gmra.mxu1 %v1138_v63 }
 0x57f   : > { %v1854_v10 = vpop.f32.mrf.mxu1 }
 0x580   : > { %1214 = vperm.xlu1 %1921, %v1088_v9  }
 0x581   : > { %v1098_v6 = vpop.f32.mrf.mxu1 }
 0x583   : > { %v1857_v11 = vpop.f32.mrf.mxu1 }
 0x584   : > { %1229 = vperm.xlu1 %1921, %v1854_v10  }
 0x585   : > { %v1108_v4 = vpop.f32.mrf.mxu1 }
 0x587   : > { %v1860_v12 = vpop.f32.mrf.mxu1 }
 0x588   : > { %1224 = vperm.xlu1 %1921, %v1098_v6  }
 0x589   : > { %v1118_v13 = vpop.f32.mrf.mxu1 }
 0x58c   : > { %1239 = vperm.xlu1 %1921, %v1857_v11  }
 0x590   : > { %1234 = vperm.xlu1 %1921, %v1108_v4  }
 0x594   : > { %1244 = vperm.xlu1 %1921, %v1118_v13  }
 0x598   : > { %1249 = vperm.xlu1 %1921, %v1860_v12  }
 0x5f7   : > { %v1220_v3 = vpop.permute.xlu1 %1219 }
 0x5f8   : > { %v1253_v32 = vmul.f32 %v1220_v3, %v1205_v25 }
 0x5fb   : > { %v1215_v5 = vpop.permute.xlu1 %1214 }
 0x5fc   : > { %v1252_v23 = vmul.f32 %v1215_v5, %v1204_v19 }
 0x5ff   : > { %v1230_v14 = vpop.permute.xlu1 %1229 }
 0x600   : > { %v1255_v28 = vmul.f32 %v1230_v14, %v1207_v21 }
 0x603   : > { %v1225_v15 = vpop.permute.xlu1 %1224 }
 0x604   : > { %v1254_v20 = vmul.f32 %v1225_v15, %v1206_v17 }
 0x607   : > { %v1240_v16 = vpop.permute.xlu1 %1239 }
 0x608   : > { %v1257_v48 = vmul.f32 %v1240_v16, %v1209_v43 }
 0x60b   : > { %v1235_v18 = vpop.permute.xlu1 %1234 }
 0x60c   : > { %v1256_v41 = vmul.f32 %v1235_v18, %v1208_v34 }
 0x60f   : > { %v1245_v26 = vpop.permute.xlu1 %1244 }
 0x610   : > { %v1258_v36 = vmul.f32 %v1245_v26, %v1210_v30 }
 0x613   : > { %v1250_v39 = vpop.permute.xlu1 %1249 }
 0x614   : > { %v1259_v45 = vmul.f32 %v1250_v39, %v1211_v38 }
 0x636   : > { %v1871_v22 = vpop.f32.mrf.mxu1 }
 0x637   : > { %v1262_v24 = vadd.f32 %v1871_v22, %v1254_v20 }
 0x638   : > { %v1173_v27 = vpop.f32.mrf.mxu1 }
 0x639   : > { %1270 = vst.msk [vmem:[#allocation4 + $0x10] sm:$0xff] %vm648_vm6, %v1262_v24  ;;  %v1260_v29 = vadd.f32 %v1252_v23, %v1173_v27 }
 0x63a   : > { %v1872_v31 = vpop.f32.mrf.mxu1 }
 0x63b   : > { %1268 = vst.msk [vmem:[#allocation4] sm:$0xff] %vm648_vm6, %v1260_v29  ;;  %v1263_v33 = vadd.f32 %v1872_v31, %v1255_v28 }
 0x63c   : > { %v1176_v35 = vpop.f32.mrf.mxu1 }
 0x63d   : > { %1271 = vst.msk [vmem:[#allocation4 + $0x18] sm:$0xff] %vm648_vm6, %v1263_v33  ;;  %v1261_v37 = vadd.f32 %v1253_v32, %v1176_v35 }
 0x63e   : > { %v1875_v40 = vpop.f32.mrf.mxu1 }
 0x63f   : > { %1269 = vst.msk [vmem:[#allocation4 + $0x8] sm:$0xff] %vm648_vm6, %v1261_v37  ;;  %v1266_v42 = vadd.f32 %v1875_v40, %v1258_v36 }
 0x640   : > { %v1189_v44 = vpop.f32.mrf.mxu1 }
 0x641   : > { %1274 = vst.msk [vmem:[#allocation4 + $0x30] sm:$0xff] %vm648_vm6, %v1266_v42  ;;  %v1264_v46 = vadd.f32 %v1256_v41, %v1189_v44 }
 0x642   : > { %v1876_v47 = vpop.f32.mrf.mxu1 }
 0x643   : > { %1272 = vst.msk [vmem:[#allocation4 + $0x20] sm:$0xff] %vm648_vm6, %v1264_v46  ;;  %v1267_v49 = vadd.f32 %v1876_v47, %v1259_v45  ;;  %1279 = sbr.rel (%p1635_p5) target bundleno = 1957 (0x7a5), region = 52 }
 0x644   : > { %v1192_v51 = vpop.f32.mrf.mxu1 }
 0x645   : > { %1275 = vst.msk [vmem:[#allocation4 + $0x38] sm:$0xff] %vm648_vm6, %v1267_v49  ;;  %v1265_v52 = vadd.f32 %v1257_v48, %v1192_v51 }
 0x647   : > { %1273 = vst.msk [vmem:[#allocation4 + $0x28] sm:$0xff] %vm648_vm6, %v1265_v52 }
 0x648   : > { %v1280_v53 = vld [vmem:[#allocation6] sm:$0xf]  ;;  %v1977_v56 = vmov 0   ;;  %v1284_v59 = vld [vmem:[%s2371_s5 + $0x10] sm:$0xff]  ;;  %v1285_v61 = vld [vmem:[%s2371_s5 + $0x18] sm:$0xff] }
 0x649   : > { %v1282_v54 = vld [vmem:[%s2371_s5] sm:$0xff]  ;;  %1932 = vrcp.f32 %v1280_v53  ;;  %1931 = vset.pattern.permute.xlu1 %v1977_v56  ;;  %1930 = vset.pattern.permute.xlu0 %v1977_v56  ;;  %v1283_v50 = vld [vmem:[%s2371_s5 + $0x8] sm:$0xff]  ;;  %v1288_v60 = vld [vmem:[%s2371_s5 + $0x30] sm:$0xff] }
 0x64a   : > { %v1286_v55 = vld [vmem:[%s2371_s5 + $0x20] sm:$0xff]  ;;  %1879 = vmatprep.mubr.msk.f32.mxu0 %vm886_vm7, %v1282_v54  ;;  %v1287_v58 = vld [vmem:[%s2371_s5 + $0x28] sm:$0xff]  ;;  %v1289_v62 = vld [vmem:[%s2371_s5 + $0x38] sm:$0xff] }
 0x64b   : > { %1885 = vmatprep.mubr.msk.f32.mxu1 %vm886_vm7, %v1286_v55  ;;  %v1423_v11 = vld [vmem:[#allocation4 + $0x8] sm:$0xff]  ;;  %v1422_v5 = vld [vmem:[#allocation4] sm:$0xff]  ;;  %v1425_v14 = vld [vmem:[#allocation4 + $0x18] sm:$0xff] }
 0x64c   : > { %v1426_v19 = vld [vmem:[#allocation4 + $0x20] sm:$0xff]  ;;  %v1424_v20 = vld [vmem:[#allocation4 + $0x10] sm:$0xff]  ;;  %v1429_v26 = vld [vmem:[#allocation4 + $0x38] sm:$0xff] }
 0x64d   : > { %v1428_v25 = vld [vmem:[#allocation4 + $0x30] sm:$0xff] }
 0x64e   : > { %v1427_v6 = vld [vmem:[#allocation4 + $0x28] sm:$0xff] }
 0x656   : > { %v1933_v57 = vpop.eup %1932 }
 0x657   : > { %1877 = vmatprep.subr.msk.mxu0 %vm851_vm3, %v1933_v57  ;;  %1893 = vmatprep.subr.msk.mxu1 %vm851_vm3, %v1933_v57 }
 0x658   : > { %1878 = vmatpush3.msk.msra.mxu0 %vm851_vm3, %v1933_v57  ;;  %1894 = vmatpush3.msk.msra.mxu1 %vm851_vm3, %v1933_v57 }
 0x659   : > { %1880 = vmatmul.mubr.msk.f32.vlgmr.msra.gmra.mxu0 %vm886_vm7, %v1283_v50  ;;  %1886 = vmatmul.mubr.msk.f32.vlgmr.msra.gmra.mxu1 %vm886_vm7, %v1287_v58 }
 0x65a   : > { %1882 = vmatprep.mubr.msk.f32.mxu0 %vm886_vm7, %v1284_v59  ;;  %1888 = vmatprep.mubr.msk.f32.mxu1 %vm886_vm7, %v1288_v60 }
 0x65d   : > { %1883 = vmatmul.mubr.msk.f32.gmra.mxu0 %vm886_vm7, %v1285_v61  ;;  %1889 = vmatmul.mubr.msk.f32.gmra.mxu1 %vm886_vm7, %v1289_v62 }
 0x719   : > { %v1881_v7 = vpop.f32.mrf.mxu0  ;;  %v1887_v2 = vpop.f32.mrf.mxu1 }
 0x71a   : > { %1457 = vperm.xlu1 %1931, %v1887_v2   ;;  %1437 = vperm.xlu0 %1930, %v1881_v7  }
 0x71b   : > { %v1383_v0 = vpop.f32.mrf.mxu0  ;;  %v1403_v1 = vpop.f32.mrf.mxu1 }
 0x71d   : > { %v1884_v8 = vpop.f32.mrf.mxu0  ;;  %v1890_v9 = vpop.f32.mrf.mxu1 }
 0x71e   : > { %1432 = vperm.xlu0 %1930, %v1383_v0   ;;  %1447 = vperm.xlu1 %1931, %v1884_v8  }
 0x71f   : > { %v1393_v63 = vpop.f32.mrf.mxu0  ;;  %v1413_v10 = vpop.f32.mrf.mxu1 }
 0x722   : > { %1452 = vperm.xlu0 %1930, %v1403_v1   ;;  %1442 = vperm.xlu1 %1931, %v1393_v63  }
 0x726   : > { %1462 = vperm.xlu0 %1930, %v1413_v10   ;;  %1467 = vperm.xlu1 %1931, %v1890_v9  }
 0x795   : > { %v1458_v4 = vpop.permute.xlu1 %1457  ;;  %v1438_v12 = vpop.permute.xlu0 %1437 }
 0x796   : > { %v1475_v13 = vmul.f32 %v1458_v4, %v1427_v6  ;;  %v1471_v3 = vmul.f32 %v1438_v12, %v1423_v11 }
 0x798   : > { %1483 = vst.msk [vmem:[#allocation7 + $0x28] sm:$0xff] %vm648_vm6, %v1475_v13  ;;  %1479 = vst.msk [vmem:[#allocation7 + $0x8] sm:$0xff] %vm648_vm6, %v1471_v3 }
 0x799   : > { %v1433_v15 = vpop.permute.xlu0 %1432  ;;  %v1448_v16 = vpop.permute.xlu1 %1447 }
 0x79a   : > { %v1470_v17 = vmul.f32 %v1433_v15, %v1422_v5  ;;  %v1473_v18 = vmul.f32 %v1448_v16, %v1425_v14 }
 0x79c   : > { %1478 = vst.msk [vmem:[#allocation7] sm:$0xff] %vm648_vm6, %v1470_v17  ;;  %1481 = vst.msk [vmem:[#allocation7 + $0x18] sm:$0xff] %vm648_vm6, %v1473_v18 }
 0x79d   : > { %v1453_v21 = vpop.permute.xlu0 %1452  ;;  %v1443_v22 = vpop.permute.xlu1 %1442 }
 0x79e   : > { %v1474_v23 = vmul.f32 %v1453_v21, %v1426_v19  ;;  %v1472_v24 = vmul.f32 %v1443_v22, %v1424_v20 }
 0x7a0   : > { %1482 = vst.msk [vmem:[#allocation7 + $0x20] sm:$0xff] %vm648_vm6, %v1474_v23  ;;  %1480 = vst.msk [vmem:[#allocation7 + $0x10] sm:$0xff] %vm648_vm6, %v1472_v24 }
 0x7a1   : > { %v1463_v27 = vpop.permute.xlu0 %1462  ;;  %v1468_v28 = vpop.permute.xlu1 %1467 }
 0x7a2   : > { %v1476_v29 = vmul.f32 %v1463_v27, %v1428_v25  ;;  %v1477_v30 = vmul.f32 %v1468_v28, %v1429_v26 }
 0x7a4   : > { %1484 = vst.msk [vmem:[#allocation7 + $0x30] sm:$0xff] %vm648_vm6, %v1476_v29  ;;  %1485 = vst.msk [vmem:[#allocation7 + $0x38] sm:$0xff] %vm648_vm6, %v1477_v30 }
 0x7a5 PF: > { %p1899_p6 = scmp.eq.s32.totalorder %s2022_s22, 2  ;;  %s1978_s8 = smov [#allocation7]  }
 0x7a6   : > { %s1492_s9 = sshll.u32 %s1978_s8, 4  ;;  %s1493_s9 = int_to_ptr.vmem [resolvable:$true] %s1492_s9 }
 0x7a7   : > { %s1934_s10 = scalar_lea.vmem %s1493_s9, 1024  ;;  %p1941_p10 = scmp.lt.s32.totalorder %s1493_s9, %s1493_s9 }
 0x7a8   : > { %p1935_p7 = scmp.ne.s32.totalorder %s1493_s9, %s1934_s10  ;;  %p1942_p11 = scmp.lt.s32.totalorder %s1934_s10, %s1934_s10 }
 0x7aa   : > { %p1936_p8 = pnand %p1935_p7, %p1899_p6  ;;  %p1943_p12 = por %p1942_p11, %p1941_p10 }
 0x7ac   : > { %p1937_p9 = pneg %p1936_p8 }
 0x7ae   : > { %p1944_p13 = pnand %p1943_p12, %p1937_p9 }
 0x7b0   : > { %1947 = shalt.err (!%p1944_p13)
}
 0x7b1   : > { %s1979_s11 = smov 128   ;;  %s1980_s12 = smov 8  }
 0x7b2   : > { %1896 = dma.vmem_to_hbm [thread:$0]  (%p1899_p6), %s1493_s9, 1024, %s2372_s6, [#allocation8], %s1979_s11, %s1979_s11, %s1980_s12  }
 0x7b3   : > { %1963 = dma.done.wait (%p1899_p6), [#allocation8], 1024  }
 0x7b4   : > { %1965 = vsyncadd (%p1899_p6), [#allocation8], 4294966272 }
 0x7b5 PF: > { %s17_s21 = sadd.s32 1, %s1968_s21  }
 0x7b6   : > { %p14_p0 = scmp.ge.s32.totalorder %s17_s21, 5  }
 0x7b8   :  { %16 = sbr.rel (!%p14_p0) target bundleno = 1 (0x1), region = 79 }
 0x7bd   :  { %1508 = vsyncpa [#allocation8], 1 }
 0x7be   :  { %1510 = vsyncpa [#allocation8 + $0x1], 1 }

</bundles_post_ra>
